<compile_context>
chip_gen: v7x
topology: tpu7x:2x2x1
jax: 0.10.0
libtpu: 0.0.40
codegen_flags: <defaults>
</compile_context>

<pallas_src>
import functools

import jax
import jax.numpy as jnp
from jax.experimental import pallas as pl
from jax.experimental.pallas import tpu as pltpu


def _round_up(x: int, m: int) -> int:
    return ((x + m - 1) // m) * m


def _seasonality_kernel(theta_ref, wb_ref, wf_ref, back_ref, fore_ref, *, two_p):
    # theta tile: (TB, 4P).  First half of the features drives the backcast,
    # second half drives the forecast.  Static ref slices; MXU matmuls with
    # f32 accumulation.
    back_ref[...] = jnp.dot(
        theta_ref[:, :two_p], wb_ref[...], preferred_element_type=jnp.float32
    ).astype(back_ref.dtype)
    fore_ref[...] = jnp.dot(
        theta_ref[:, two_p:], wf_ref[...], preferred_element_type=jnp.float32
    ).astype(fore_ref.dtype)


def make_seasonality_templates(harmonics: int, backcast_size: int, forecast_size: int):
    """Exactly mirrors the PyTorch buffer construction (f32)."""
    freq_tail = (
        jnp.arange(harmonics, harmonics / 2 * forecast_size, dtype=jnp.float32)
        / harmonics
    )
    frequency = jnp.concatenate([jnp.zeros((1,), jnp.float32), freq_tail])[:, None]
    back_t = jnp.arange(backcast_size, dtype=jnp.float32)[None, :] / backcast_size
    fore_t = jnp.arange(forecast_size, dtype=jnp.float32)[None, :] / forecast_size
    backcast_grid = -2.0 * jnp.pi * back_t * frequency  # (P, backcast_size)
    forecast_grid = 2.0 * jnp.pi * fore_t * frequency   # (P, forecast_size)
    return (
        jnp.cos(backcast_grid),
        jnp.sin(backcast_grid),
        jnp.cos(forecast_grid),
        jnp.sin(forecast_grid),
    )


def make_stacked_templates(bc_cos, bc_sin, fc_cos, fc_sin):
    """Build the two resident templates once at module init (f32).

    W_back: (2P, backcast_size), W_fore: (2P, forecast_size).
    """
    w_back = jnp.concatenate([bc_cos, bc_sin], axis=0).astype(jnp.float32)
    w_fore = jnp.concatenate([fc_cos, fc_sin], axis=0).astype(jnp.float32)
    return w_back, w_fore


def seasonality_basis_forward(theta, w_back, w_fore, *, batch_tile=512):
    """theta: (B, 4P).  w_back: (2P, bs).  w_fore: (2P, fs).

    Returns (backcast (B, bs), forecast (B, fs)), both f32.
    """
    B, K = theta.shape
    two_p, bs = w_back.shape
    two_p2, fs = w_fore.shape
    assert two_p == two_p2, "backcast/forecast templates must share 2P rows"
    assert K == 2 * two_p, "theta feature dim must equal 4 * params_per_harmonic"

    theta = theta.astype(jnp.float32)

    # ---- Batch tiling (sublane dim must be a multiple of 8). ----
    B8 = _round_up(B, 8)
    TB = min(B8, _round_up(max(int(batch_tile), 8), 8))
    # If the whole batch would be a single tile but is large enough to split,
    # use two tiles so ("parallel",) can shard across v7x's two TensorCores.
    if TB == B8 and B8 >= 32:
        TB = _round_up(B8 // 2, 8)
    B_pad = _round_up(B, TB)

    if B_pad != B:
        # Only the batch dim is padded (cheap); feature dim stays unpadded.
        theta = jnp.zeros((B_pad, K), jnp.float32).at[:B, :].set(theta)

    grid = (B_pad // TB,)

    # ---- VMEM budget for the chosen tile (generation-aware cap). ----
    itemsize = 4
    per_step_bytes = (
        2 * TB * K * itemsize          # double-buffered theta tile
        + 2 * TB * bs * itemsize       # double-buffered backcast tile
        + 2 * TB * fs * itemsize       # double-buffered forecast tile
        + 2 * two_p * (bs + fs) * itemsize  # resident templates (+headroom)
    )
    vmem_limit = int(min(max(2 * per_step_bytes + (4 << 20), 16 << 20), 48 << 20))

    # Real (unpadded) work for the scheduler hint.
    cost = pl.CostEstimate(
        flops=2 * B * two_p * (bs + fs),
        transcendentals=0,
        bytes_accessed=(B * K + two_p * (bs + fs) + B * (bs + fs)) * itemsize,
    )

    kernel = functools.partial(_seasonality_kernel, two_p=two_p)

    back, fore = pl.pallas_call(
        kernel,
        out_shape=(
            jax.ShapeDtypeStruct((B_pad, bs), jnp.float32),
            jax.ShapeDtypeStruct((B_pad, fs), jnp.float32),
        ),
        grid=grid,
        in_specs=[
            # Batch-tiled theta; feature dim = full extent (no padding needed).
            pl.BlockSpec((TB, K), lambda i: (i, 0)),
            # Templates: constant block index -> stay VMEM-resident across steps.
            pl.BlockSpec((two_p, bs), lambda i: (0, 0)),
            pl.BlockSpec((two_p, fs), lambda i: (0, 0)),
        ],
        out_specs=(
            pl.BlockSpec((TB, bs), lambda i: (i, 0)),
            pl.BlockSpec((TB, fs), lambda i: (i, 0)),
        ),
        compiler_params=pltpu.CompilerParams(
            dimension_semantics=("parallel",),
            vmem_limit_bytes=vmem_limit,
        ),
        cost_estimate=cost,
    )(theta, w_back, w_fore)

    if B_pad != B:
        back = back[:B]
        fore = fore[:B]
    return back, fore


def _reference_forward(theta, bc_cos, bc_sin, fc_cos, fc_sin):
    """Pure-JAX transcription of SeasonalityBasis.forward."""
    P = theta.shape[1] // 4
    backcast = theta[:, :P] @ bc_cos + theta[:, P:2 * P] @ bc_sin
    forecast = theta[:, 3 * P:] @ fc_sin + theta[:, 2 * P:3 * P] @ fc_cos
    return backcast, forecast


if __name__ == "__main__":
    # Small shapes consistent with the module.
    harmonics = 2
    backcast_size = 16
    forecast_size = 8
    batch = 8

    bc_cos, bc_sin, fc_cos, fc_sin = make_seasonality_templates(
        harmonics, backcast_size, forecast_size)
    P = bc_cos.shape[0]          # params per harmonic (= 7 here)
    theta_dim = 4 * P

    key = jax.random.PRNGKey(0)
    theta = jax.random.normal(key, (batch, theta_dim), jnp.float32)

    # Built once at "module init" (mirrors register_buffer).
    w_back, w_fore = make_stacked_templates(bc_cos, bc_sin, fc_cos, fc_sin)

    backcast, forecast = seasonality_basis_forward(theta, w_back, w_fore)
    jax.block_until_ready((backcast, forecast))

    ref_back, ref_fore = _reference_forward(theta, bc_cos, bc_sin, fc_cos, fc_sin)
    assert backcast.shape == (batch, backcast_size)
    assert forecast.shape == (batch, forecast_size)
    assert jnp.allclose(backcast, ref_back, atol=1e-5, rtol=1e-5)
    assert jnp.allclose(forecast, ref_fore, atol=1e-5, rtol=1e-5)

    print("KERNEL_OK")
</pallas_src>

<mosaic_0001>
module attributes {stable_mosaic.version = 11 : i64} {
  func.func @_seasonality_kernel(%arg0: i32, %arg1: memref<8x28xf32, #tpu.memory_space<vmem>>, %arg2: memref<14x16xf32, #tpu.memory_space<vmem>>, %arg3: memref<14x8xf32, #tpu.memory_space<vmem>>, %arg4: memref<8x16xf32, #tpu.memory_space<vmem>>, %arg5: memref<8x8xf32, #tpu.memory_space<vmem>>) attributes {dimension_semantics = [#tpu.dimension_semantics<parallel>], iteration_bounds = array<i64: 1>, scalar_prefetch = 0 : i64, scratch_operands = 0 : i64, tpu.core_type = #tpu.core_type<tc>, window_params = [{transform_indices = @transform_0, window_bounds = array<i64: 8, 28>}, {pipeline_mode = #tpu.pipeline_mode<synchronous>, transform_indices = @transform_1, window_bounds = array<i64: 14, 16>}, {pipeline_mode = #tpu.pipeline_mode<synchronous>, transform_indices = @transform_2, window_bounds = array<i64: 14, 8>}, {transform_indices = @transform_3, window_bounds = array<i64: 8, 16>}, {transform_indices = @transform_4, window_bounds = array<i64: 8, 8>}]} {
    %c0 = arith.constant 0 : index
    %c0_0 = arith.constant 0 : index
    %0 = vector.load %arg1[%c0, %c0_0] : memref<8x28xf32, #tpu.memory_space<vmem>>, vector<8x14xf32>
    %c0_1 = arith.constant 0 : index
    %c0_2 = arith.constant 0 : index
    %1 = vector.load %arg2[%c0_1, %c0_2] : memref<14x16xf32, #tpu.memory_space<vmem>>, vector<14x16xf32>
    %cst = arith.constant dense<0.000000e+00> : vector<8x16xf32>
    %2 = tpu.matmul %0, %1, %cst {dimension_numbers = #tpu.dot_dimension_numbers<[1], [0], [0], [1], [0, 0, 1, 1], [], []>} : vector<8x14xf32>, vector<14x16xf32>, vector<8x16xf32> -> vector<8x16xf32>
    %c0_3 = arith.constant 0 : index
    %c0_4 = arith.constant 0 : index
    %3 = vector.load %arg4[%c0_3, %c0_4] : memref<8x16xf32, #tpu.memory_space<vmem>>, vector<8x16xf32>
    tpu.vector_store %arg4[%c0_3, %c0_4], %2 {strides = array<i32>} : memref<8x16xf32, #tpu.memory_space<vmem>>, vector<8x16xf32>,
    %c0_5 = arith.constant 0 : index
    %c14 = arith.constant 14 : index
    %4 = vector.load %arg1[%c0_5, %c14] : memref<8x28xf32, #tpu.memory_space<vmem>>, vector<8x14xf32>
    %c0_6 = arith.constant 0 : index
    %c0_7 = arith.constant 0 : index
    %5 = vector.load %arg3[%c0_6, %c0_7] : memref<14x8xf32, #tpu.memory_space<vmem>>, vector<14x8xf32>
    %cst_8 = arith.constant dense<0.000000e+00> : vector<8x8xf32>
    %6 = tpu.matmul %4, %5, %cst_8 {dimension_numbers = #tpu.dot_dimension_numbers<[1], [0], [0], [1], [0, 0, 1, 1], [], []>} : vector<8x14xf32>, vector<14x8xf32>, vector<8x8xf32> -> vector<8x8xf32>
    %c0_9 = arith.constant 0 : index
    %c0_10 = arith.constant 0 : index
    %7 = vector.load %arg5[%c0_9, %c0_10] : memref<8x8xf32, #tpu.memory_space<vmem>>, vector<8x8xf32>
    tpu.vector_store %arg5[%c0_9, %c0_10], %6 {strides = array<i32>} : memref<8x8xf32, #tpu.memory_space<vmem>>, vector<8x8xf32>,
    return
  }
  func.func @transform_0(%arg0: i32) -> (i32, i32) {
    %c0_i32 = arith.constant 0 : i32
    %c0_i32_0 = arith.constant 0 : i32
    return %arg0, %c0_i32 : i32, i32
  }
  func.func @transform_1(%arg0: i32) -> (i32, i32) {
    %c0_i32 = arith.constant 0 : i32
    %c0_i32_0 = arith.constant 0 : i32
    %c0_i32_1 = arith.constant 0 : i32
    return %c0_i32, %c0_i32_0 : i32, i32
  }
  func.func @transform_2(%arg0: i32) -> (i32, i32) {
    %c0_i32 = arith.constant 0 : i32
    %c0_i32_0 = arith.constant 0 : i32
    %c0_i32_1 = arith.constant 0 : i32
    return %c0_i32, %c0_i32_0 : i32, i32
  }
  func.func @transform_3(%arg0: i32) -> (i32, i32) {
    %c0_i32 = arith.constant 0 : i32
    %c0_i32_0 = arith.constant 0 : i32
    return %arg0, %c0_i32 : i32, i32
  }
  func.func @transform_4(%arg0: i32) -> (i32, i32) {
    %c0_i32 = arith.constant 0 : i32
    %c0_i32_0 = arith.constant 0 : i32
    return %arg0, %c0_i32 : i32, i32
  }
}

</mosaic_0001>

<bundles_post_ra>
// kernel: tpu_custom_call.1
= control target key start
LH: loop header
LB: loop body
LE: loop exit
PB: predicated region body
PF: predicated region fallthrough
CT: control target
= control target key end

     0   :  { %10 = vsyncpa [#allocation3], 0  ;;  %s299_s21 = smov 114   ;;  %v300_v3 = vmov 0.0|0.0   ;;  %vm25_vm0 = vcmask 1045504   ;;  %vm301_vm1 = vmmov 1   ;;  %s370_s0 = inlined_call_operand.vmem [shape: f32[8,28], index: 0, kind: input, shape index: {}]   ;;  %s371_s1 = inlined_call_operand.vmem [shape: f32[14,16], index: 1, kind: input, shape index: {}]   ;;  %s372_s2 = inlined_call_operand.vmem [shape: f32[14,8], index: 2, kind: input, shape index: {}]   ;;  %s373_s3 = inlined_call_operand.hbm [shape: f32[8,16], index: 3, kind: output, shape index: {0}]   ;;  %s374_s4 = inlined_call_operand.hbm [shape: f32[8,8], index: 4, kind: output, shape index: {1}]  }
   0x1   :  { %v101_v0 = vld [vmem:[%s370_s0] sm:$0xff]  ;;  %v20_v2 = vld [vmem:[%s371_s1 + $0x8] sm:$0x3f]  ;;  %236 = vmatprep.subr.bf16.mxu0 %v300_v3  ;;  %vm238_vm2 = vmpackc.low %vm25_vm0, %vm301_vm1  ;;  %240 = vmatprep.subr.bf16.mxu1 %v300_v3  ;;  %vm302_vm3 = vmmov 0   ;;  %v303_v8 = vmov 0.0   ;;  %vm21_vm4 = vcmask 113664  }
   0x2   :  { %v19_v1 = vld [vmem:[%s371_s1] sm:$0xff]  ;;  %105 = vrot.lane.b32.xlu0 %v101_v0, %s299_s21  ;;  %v103_v6 = vld [vmem:[%s372_s2 + $0x8] sm:$0x3f]  ;;  %226 = vmatprep.mubr.msk.f32.mxu0 %vm302_vm3, %v303_v8 }
   0x3   :  { %v237_v4 = vpack.c.bf16 %v20_v2, %v19_v1  ;;  %v102_v5 = vld [vmem:[%s372_s2] sm:$0xff] }
   0x4   :  { %v241_v7 = vpack.c.bf16 %v103_v6, %v102_v5 }
   0x5   :  { %239 = vmatpush3.bf16.msk.msra.mxu0 %vm238_vm2, %v237_v4 }
   0x6   :  { %11 = vsyncpa [#allocation5], 0  ;;  %243 = vmatpush3.bf16.msk.msra.mxu1 %vm238_vm2, %v241_v7  ;;  %233 = vmatprep.mubr.msk.f32.mxu1 %vm302_vm3, %v303_v8  ;;  %s304_s1 = smov [#allocation2]   ;;  %vm99_vm5 = vcmask 130048  }
   0x7   :  { %s190_s25 = sshll.u32 %s304_s1, 4  ;;  %s191_s25 = int_to_ptr.vmem [resolvable:$true] %s190_s25 }
   0x8   :  { %227 = vmatmul.mubr.msk.f32.vlgmr.msra.gmra.mrb[0].mxu0 %vm21_vm4, %v101_v0  ;;  %s251_s2 = scalar_lea.vmem %s191_s25, 128  ;;  %p256_p1 = scmp.lt.s32.totalorder %s191_s25, %s191_s25 }
   0x9   :  { %p252_p0 = scmp.ne.s32.totalorder %s191_s25, %s251_s2  ;;  %p257_p2 = scmp.lt.s32.totalorder %s251_s2, %s251_s2 }
   0xb   :  { %p258_p3 = por %p257_p2, %p256_p1 }
   0xd   :  { %p259_p4 = pnand %p258_p3, %p252_p0 }
  0x74   :  { %v106_v9 = vpop.permute.xlu0 %105 }
  0x75   :  { %234 = vmatmul.mubr.msk.f32.vlgmr.msra.gmra.mrb[0].mxu1 %vm21_vm4, %v106_v9 }
  0xdb   :  { %v95_v10 = vpop.f32.mrb[0].mxu0 }
  0xdc   :  { %v228_v11 = vpop.f32.mrb[1].mxu0  ;;  %100 = vst.msk [vmem:[#allocation2] sm:$0xff] %vm99_vm5, %v95_v10 }
  0xdd   :  { %262 = shalt.err (!%p259_p4)
}
  0xde   :  { %s263_s28 = scalar_lea.hbm %s373_s3, 128 }
  0xdf   :  { %p264_p5 = scmp.ne.s32.totalorder %s373_s3, %s263_s28  ;;  %p267_p6 = scmp.lt.u32.totalorder %s263_s28, %s373_s3 }
  0xe1   :  { %p269_p7 = pnand %p267_p6, %p264_p5 }
  0xe3   :  { %272 = shalt.err (!%p269_p7)
}
  0xe4   :  { %193 = dma.vmem_to_hbm [thread:$0]  %s191_s25, 128, %s373_s3, [#allocation3]   ;;  %vm182_vm6 = vcmask 64512  }
  0xe5   :  { %s305_s9 = smov [#allocation4]  }
  0xe6   :  { %s200_s10 = sshll.u32 %s305_s9, 4  ;;  %s201_s10 = int_to_ptr.vmem [resolvable:$true] %s200_s10 }
  0xe7   :  { %s273_s11 = scalar_lea.vmem %s201_s10, 128  ;;  %p278_p9 = scmp.lt.s32.totalorder %s201_s10, %s201_s10 }
  0xe8   :  { %p274_p8 = scmp.ne.s32.totalorder %s201_s10, %s273_s11  ;;  %p279_p10 = scmp.lt.s32.totalorder %s273_s11, %s273_s11 }
  0xea   :  { %p280_p11 = por %p279_p10, %p278_p9 }
  0xec   :  { %p281_p12 = pnand %p280_p11, %p274_p8 }
 0x148   :  { %v178_v12 = vpop.f32.mrb[0].mxu1 }
 0x149   :  { %183 = vst.msk [vmem:[#allocation4] sm:$0xff] %vm182_vm6, %v178_v12  ;;  %v235_v13 = vpop.f32.mrb[1].mxu1 }
 0x14a   :  { %284 = shalt.err (!%p281_p12)
}
 0x14b   :  { %s285_s14 = scalar_lea.hbm %s374_s4, 128 }
 0x14c   :  { %p286_p13 = scmp.ne.s32.totalorder %s374_s4, %s285_s14  ;;  %p289_p0 = scmp.lt.u32.totalorder %s285_s14, %s374_s4 }
 0x14e   :  { %p291_p1 = pnand %p289_p0, %p286_p13 }
 0x150   :  { %294 = shalt.err (!%p291_p1)
}
 0x151   :  { %203 = dma.vmem_to_hbm [thread:$0]  %s201_s10, 128, %s374_s4, [#allocation5]  }
 0x152   :  { %295 = dma.done.wait [#allocation3], 128  }
 0x153   :  { %296 = vsyncadd [#allocation3], 4294967168 }
 0x154   :  { %297 = dma.done.wait [#allocation5], 128  }
 0x155   :  { %298 = vsyncadd [#allocation5], 4294967168 }
 0x156   :  { %210 = vsyncpa [#allocation3], 1 }
 0x157   :  { %211 = vsyncpa [#allocation5], 1 }

</bundles_post_ra>
